<compile_context>
chip_gen: v6e
topology: v6e:2x2x1
jax: 0.10.0
libtpu: 0.0.40
codegen_flags: <defaults>
</compile_context>

<pallas_src>
import jax
import jax.numpy as jnp
from jax.experimental import pallas as pl
from jax.experimental.pallas import tpu as pltpu

IN_DIM = 8
LAYER_DIMS = ((6, 8), (4, 6), (2, 4), (1, 2))  # (out_features, in_features), torch order
_PAD = 8  # every layer width padded to one 8-sublane row group


def _round_up(n, m):
    return ((n + m - 1) // m) * m


def _sigmoid(x):
    # sigmoid(x) = 0.5 * (tanh(0.5 x) + 1): a single EUP transcendental plus
    # cheap VPU mul/add instead of exp + reciprocal (2 EUP ops).
    return 0.5 * (jnp.tanh(0.5 * x) + 1.0)


def _layer_vpu(h, w, b, in_dim):
    """sigmoid(w @ h + b) with batch on lanes, as `in_dim` broadcast
    multiply-adds on the VPU (an MXU dot would be >90% padding here).

    h: [8, TB] (rows >= in_dim hold junk from padding and are never read),
    w: [8, 8] zero-padded, b: [8, 1] zero-padded -> [8, TB].
    """
    tb = h.shape[1]
    acc = jnp.broadcast_to(b, (_PAD, tb))
    for i in range(in_dim):                 # static unroll, <= 6 iterations
        acc = acc + w[:, i:i + 1] * h[i:i + 1, :]
    return _sigmoid(acc)


def _mlp_kernel(x_ref, w_ref, b_ref, o_ref):
    x = x_ref[...]                  # [TB, 8]  native HBM layout (batch on sublanes)
    w = w_ref[...]                  # [4, 8, 8] zero-padded weights, resident
    b = b_ref[...]                  # [4, 8, 1] zero-padded biases, resident

    # Layer 1 on the MXU: contract the trailing feature dim of both operands
    # ("NT" dot), so the result [8, TB] already has batch on the 128-wide lane
    # axis -- no explicit transpose, no wrapper-side relayout.
    pre = jax.lax.dot_general(
        w[0], x,
        dimension_numbers=(((1,), (1,)), ((), ())),
        preferred_element_type=jnp.float32)          # [8, TB]
    h = _sigmoid(pre + b[0])                          # rows 6,7 junk, never read

    # Layers 2-4 on the VPU; batch stays lane-dense throughout.
    h = _layer_vpu(h, w[1], b[1], in_dim=6)          # rows 0:4 valid
    h = _layer_vpu(h, w[2], b[2], in_dim=4)          # rows 0:2 valid
    h = _layer_vpu(h, w[3], b[3], in_dim=2)          # row 0 valid

    o_ref[...] = h[0:1, :].astype(o_ref.dtype)       # lane-dense [1, TB] store


def _pack_params(params):
    """Zero-pad each layer to [8, 8] / [8, 1] and stack into two arrays so the
    kernel needs only two small resident weight blocks (one DMA each)."""
    w_all = jnp.zeros((len(LAYER_DIMS), _PAD, _PAD), jnp.float32)
    b_all = jnp.zeros((len(LAYER_DIMS), _PAD, 1), jnp.float32)
    for l, (out_d, in_d) in enumerate(LAYER_DIMS):
        w_all = w_all.at[l, :out_d, :in_d].set(params[f"w{l + 1}"])
        b_all = b_all.at[l, :out_d, 0].set(params[f"b{l + 1}"])
    return w_all, b_all


def mlp_forward(x, params, *, tb=32768):
    """x: [B, 8] f32 -> [B, 1] f32 (same interface/semantics as the torch module).

    `tb` is the batch tile mapped to the 128-wide lane axis. The 32K default
    keeps per-grid-step overhead <10% while per-step VMEM (~9 MiB) stays well
    under the 32 MiB limit set below (and v7x's 64 MiB physical). Keep
    tb <= 64K; it is shrunk automatically for small batches.
    """
    assert x.ndim == 2 and x.shape[1] == IN_DIM
    assert tb % 128 == 0 and tb >= 128, "lane tile must be a positive multiple of 128"
    B = x.shape[0]

    # Shrink the tile for small batches: keeps tail padding modest and gives
    # v7x's two TensorCores at least two "parallel" grid steps whenever B > 128.
    tb_eff = min(tb, max(128, _round_up(pl.cdiv(B, 2), 128)))
    n_blocks = pl.cdiv(B, tb_eff)
    b_pad = n_blocks * tb_eff

    w_all, b_all = _pack_params(params)

    out_t = pl.pallas_call(
        _mlp_kernel,
        out_shape=jax.ShapeDtypeStruct((1, b_pad), jnp.float32),
        grid=(n_blocks,),
        in_specs=[
            # x in its native [B, 8] layout; the ragged boundary block only
            # produces junk in batch columns >= B, which never reach the result.
            pl.BlockSpec((tb_eff, IN_DIM), lambda i: (i, 0)),
            # Constant index maps: weights/biases are DMA'd once and stay resident.
            pl.BlockSpec((len(LAYER_DIMS), _PAD, _PAD), lambda i: (0, 0, 0)),
            pl.BlockSpec((len(LAYER_DIMS), _PAD, 1), lambda i: (0, 0, 0)),
        ],
        out_specs=pl.BlockSpec((1, tb_eff), lambda i: (0, i)),
        compiler_params=pltpu.CompilerParams(
            dimension_semantics=("parallel",),      # v7x: shard batch grid over 2 TCs
            vmem_limit_bytes=32 * 1024 * 1024,      # above v5e's 16 MiB scoped default
        ),
    )(x.astype(jnp.float32), w_all, b_all)

    return out_t[:, :B].T                            # [B, 1]


def init_params(key):
    """torch.nn.Linear-style init: U(+-1/sqrt(fan_in)); w [out, in], b [out]."""
    params = {}
    for idx, (out_d, in_d) in enumerate(LAYER_DIMS, start=1):
        key, kw, kb = jax.random.split(key, 3)
        bound = 1.0 / (in_d ** 0.5)
        params[f"w{idx}"] = jax.random.uniform(
            kw, (out_d, in_d), jnp.float32, minval=-bound, maxval=bound)
        params[f"b{idx}"] = jax.random.uniform(
            kb, (out_d,), jnp.float32, minval=-bound, maxval=bound)
    return params


def reference_forward(x, params):
    """Exact-f32 reference (elementwise multiply + sum; no matmul precision ambiguity)."""
    h = x
    for idx in range(1, len(LAYER_DIMS) + 1):
        w = params[f"w{idx}"]                        # [out, in]
        b = params[f"b{idx}"]                        # [out]
        pre = jnp.sum(h[:, None, :] * w[None, :, :], axis=-1) + b[None, :]
        h = jax.nn.sigmoid(pre)
    return h


if __name__ == "__main__":
    key = jax.random.PRNGKey(0)
    key, kx = jax.random.split(key)

    B = 600                    # exercises a 2-step grid + a ragged boundary block
    x = jax.random.normal(kx, (B, IN_DIM), jnp.float32)
    params = init_params(key)

    out = jax.block_until_ready(mlp_forward(x, params))

    ref = reference_forward(x, params)
    assert out.shape == (B, 1)
    # 1e-4 leaves room for the MXU's multi-pass f32 accumulation order in
    # layer 1; layers 2-4 are exact f32 on the VPU.
    assert jnp.allclose(out, ref, atol=1e-4, rtol=1e-4), "mismatch vs reference"

    print("KERNEL_OK")
</pallas_src>

<mosaic_0001>
module attributes {stable_mosaic.version = 11 : i64} {
  func.func @_mlp_kernel(%arg0: i32, %arg1: memref<384x8xf32, #tpu.memory_space<vmem>>, %arg2: memref<4x8x8xf32, #tpu.memory_space<vmem>>, %arg3: memref<4x8x1xf32, #tpu.memory_space<vmem>>, %arg4: memref<1x384xf32, #tpu.memory_space<vmem>>) attributes {dimension_semantics = [#tpu.dimension_semantics<parallel>], iteration_bounds = array<i64: 2>, scalar_prefetch = 0 : i64, scratch_operands = 0 : i64, tpu.core_type = #tpu.core_type<tc>, window_params = [{transform_indices = @transform_0, window_bounds = array<i64: 384, 8>}, {pipeline_mode = #tpu.pipeline_mode<synchronous>, transform_indices = @transform_1, window_bounds = array<i64: 4, 8, 8>}, {pipeline_mode = #tpu.pipeline_mode<synchronous>, transform_indices = @transform_2, window_bounds = array<i64: 4, 8, 1>}, {transform_indices = @transform_3, window_bounds = array<i64: 1, 384>}]} {
    %c0 = arith.constant 0 : index
    %c0_0 = arith.constant 0 : index
    %0 = vector.load %arg1[%c0, %c0_0] : memref<384x8xf32, #tpu.memory_space<vmem>>, vector<384x8xf32>
    %c0_1 = arith.constant 0 : index
    %c0_2 = arith.constant 0 : index
    %c0_3 = arith.constant 0 : index
    %1 = vector.load %arg2[%c0_1, %c0_2, %c0_3] : memref<4x8x8xf32, #tpu.memory_space<vmem>>, vector<4x8x8xf32>
    %c0_4 = arith.constant 0 : index
    %c0_5 = arith.constant 0 : index
    %c0_6 = arith.constant 0 : index
    %2 = vector.load %arg3[%c0_4, %c0_5, %c0_6] : memref<4x8x1xf32, #tpu.memory_space<vmem>>, vector<4x8x1xf32>
    %3 = vector.extract_strided_slice %1 {offsets = [0, 0, 0], sizes = [1, 8, 8], strides = [1, 1, 1]} : vector<4x8x8xf32> to vector<1x8x8xf32>
    %4 = vector.shape_cast %3 : vector<1x8x8xf32> to vector<8x8xf32>
    %cst = arith.constant dense<0.000000e+00> : vector<8x384xf32>
    %5 = tpu.matmul %4, %0, %cst {dimension_numbers = #tpu.dot_dimension_numbers<[1], [1], [0], [0], [0, 0, 1, 0], [], []>} : vector<8x8xf32>, vector<384x8xf32>, vector<8x384xf32> -> vector<8x384xf32>
    %6 = vector.extract_strided_slice %2 {offsets = [0, 0, 0], sizes = [1, 8, 1], strides = [1, 1, 1]} : vector<4x8x1xf32> to vector<1x8x1xf32>
    %7 = vector.shape_cast %6 : vector<1x8x1xf32> to vector<8x1xf32>
    %8 = vector.broadcast %7 : vector<8x1xf32> to vector<8x384xf32>
    %9 = arith.addf %5, %8 : vector<8x384xf32>
    %cst_7 = arith.constant 5.000000e-01 : f32
    %10 = vector.broadcast %cst_7 : f32 to vector<8x384xf32>
    %11 = arith.mulf %10, %9 : vector<8x384xf32>
    %12 = math.tanh %11 : vector<8x384xf32>
    %cst_8 = arith.constant 1.000000e+00 : f32
    %13 = vector.broadcast %cst_8 : f32 to vector<8x384xf32>
    %14 = arith.addf %12, %13 : vector<8x384xf32>
    %cst_9 = arith.constant 5.000000e-01 : f32
    %15 = vector.broadcast %cst_9 : f32 to vector<8x384xf32>
    %16 = arith.mulf %15, %14 : vector<8x384xf32>
    %17 = vector.extract_strided_slice %1 {offsets = [1, 0, 0], sizes = [1, 8, 8], strides = [1, 1, 1]} : vector<4x8x8xf32> to vector<1x8x8xf32>
    %18 = vector.shape_cast %17 : vector<1x8x8xf32> to vector<8x8xf32>
    %19 = vector.extract_strided_slice %2 {offsets = [1, 0, 0], sizes = [1, 8, 1], strides = [1, 1, 1]} : vector<4x8x1xf32> to vector<1x8x1xf32>
    %20 = vector.shape_cast %19 : vector<1x8x1xf32> to vector<8x1xf32>
    %21 = vector.shape_cast %20 : vector<8x1xf32> to vector<8x1xf32>
    %22 = vector.broadcast %21 : vector<8x1xf32> to vector<8x384xf32>
    %23 = vector.extract_strided_slice %18 {offsets = [0, 0], sizes = [8, 1], strides = [1, 1]} : vector<8x8xf32> to vector<8x1xf32>
    %24 = vector.extract_strided_slice %16 {offsets = [0, 0], sizes = [1, 384], strides = [1, 1]} : vector<8x384xf32> to vector<1x384xf32>
    %25 = vector.broadcast %23 : vector<8x1xf32> to vector<8x384xf32>
    %26 = vector.broadcast %24 : vector<1x384xf32> to vector<8x384xf32>
    %27 = arith.mulf %25, %26 : vector<8x384xf32>
    %28 = arith.addf %22, %27 : vector<8x384xf32>
    %29 = vector.extract_strided_slice %18 {offsets = [0, 1], sizes = [8, 1], strides = [1, 1]} : vector<8x8xf32> to vector<8x1xf32>
    %30 = vector.extract_strided_slice %16 {offsets = [1, 0], sizes = [1, 384], strides = [1, 1]} : vector<8x384xf32> to vector<1x384xf32>
    %31 = vector.broadcast %29 : vector<8x1xf32> to vector<8x384xf32>
    %32 = vector.broadcast %30 : vector<1x384xf32> to vector<8x384xf32>
    %33 = arith.mulf %31, %32 : vector<8x384xf32>
    %34 = arith.addf %28, %33 : vector<8x384xf32>
    %35 = vector.extract_strided_slice %18 {offsets = [0, 2], sizes = [8, 1], strides = [1, 1]} : vector<8x8xf32> to vector<8x1xf32>
    %36 = vector.extract_strided_slice %16 {offsets = [2, 0], sizes = [1, 384], strides = [1, 1]} : vector<8x384xf32> to vector<1x384xf32>
    %37 = vector.broadcast %35 : vector<8x1xf32> to vector<8x384xf32>
    %38 = vector.broadcast %36 : vector<1x384xf32> to vector<8x384xf32>
    %39 = arith.mulf %37, %38 : vector<8x384xf32>
    %40 = arith.addf %34, %39 : vector<8x384xf32>
    %41 = vector.extract_strided_slice %18 {offsets = [0, 3], sizes = [8, 1], strides = [1, 1]} : vector<8x8xf32> to vector<8x1xf32>
    %42 = vector.extract_strided_slice %16 {offsets = [3, 0], sizes = [1, 384], strides = [1, 1]} : vector<8x384xf32> to vector<1x384xf32>
    %43 = vector.broadcast %41 : vector<8x1xf32> to vector<8x384xf32>
    %44 = vector.broadcast %42 : vector<1x384xf32> to vector<8x384xf32>
    %45 = arith.mulf %43, %44 : vector<8x384xf32>
    %46 = arith.addf %40, %45 : vector<8x384xf32>
    %47 = vector.extract_strided_slice %18 {offsets = [0, 4], sizes = [8, 1], strides = [1, 1]} : vector<8x8xf32> to vector<8x1xf32>
    %48 = vector.extract_strided_slice %16 {offsets = [4, 0], sizes = [1, 384], strides = [1, 1]} : vector<8x384xf32> to vector<1x384xf32>
    %49 = vector.broadcast %47 : vector<8x1xf32> to vector<8x384xf32>
    %50 = vector.broadcast %48 : vector<1x384xf32> to vector<8x384xf32>
    %51 = arith.mulf %49, %50 : vector<8x384xf32>
    %52 = arith.addf %46, %51 : vector<8x384xf32>
    %53 = vector.extract_strided_slice %18 {offsets = [0, 5], sizes = [8, 1], strides = [1, 1]} : vector<8x8xf32> to vector<8x1xf32>
    %54 = vector.extract_strided_slice %16 {offsets = [5, 0], sizes = [1, 384], strides = [1, 1]} : vector<8x384xf32> to vector<1x384xf32>
    %55 = vector.broadcast %53 : vector<8x1xf32> to vector<8x384xf32>
    %56 = vector.broadcast %54 : vector<1x384xf32> to vector<8x384xf32>
    %57 = arith.mulf %55, %56 : vector<8x384xf32>
    %58 = arith.addf %52, %57 : vector<8x384xf32>
    %cst_10 = arith.constant 5.000000e-01 : f32
    %59 = vector.broadcast %cst_10 : f32 to vector<8x384xf32>
    %60 = arith.mulf %59, %58 : vector<8x384xf32>
    %61 = math.tanh %60 : vector<8x384xf32>
    %cst_11 = arith.constant 1.000000e+00 : f32
    %62 = vector.broadcast %cst_11 : f32 to vector<8x384xf32>
    %63 = arith.addf %61, %62 : vector<8x384xf32>
    %cst_12 = arith.constant 5.000000e-01 : f32
    %64 = vector.broadcast %cst_12 : f32 to vector<8x384xf32>
    %65 = arith.mulf %64, %63 : vector<8x384xf32>
    %66 = vector.extract_strided_slice %1 {offsets = [2, 0, 0], sizes = [1, 8, 8], strides = [1, 1, 1]} : vector<4x8x8xf32> to vector<1x8x8xf32>
    %67 = vector.shape_cast %66 : vector<1x8x8xf32> to vector<8x8xf32>
    %68 = vector.extract_strided_slice %2 {offsets = [2, 0, 0], sizes = [1, 8, 1], strides = [1, 1, 1]} : vector<4x8x1xf32> to vector<1x8x1xf32>
    %69 = vector.shape_cast %68 : vector<1x8x1xf32> to vector<8x1xf32>
    %70 = vector.shape_cast %69 : vector<8x1xf32> to vector<8x1xf32>
    %71 = vector.broadcast %70 : vector<8x1xf32> to vector<8x384xf32>
    %72 = vector.extract_strided_slice %67 {offsets = [0, 0], sizes = [8, 1], strides = [1, 1]} : vector<8x8xf32> to vector<8x1xf32>
    %73 = vector.extract_strided_slice %65 {offsets = [0, 0], sizes = [1, 384], strides = [1, 1]} : vector<8x384xf32> to vector<1x384xf32>
    %74 = vector.broadcast %72 : vector<8x1xf32> to vector<8x384xf32>
    %75 = vector.broadcast %73 : vector<1x384xf32> to vector<8x384xf32>
    %76 = arith.mulf %74, %75 : vector<8x384xf32>
    %77 = arith.addf %71, %76 : vector<8x384xf32>
    %78 = vector.extract_strided_slice %67 {offsets = [0, 1], sizes = [8, 1], strides = [1, 1]} : vector<8x8xf32> to vector<8x1xf32>
    %79 = vector.extract_strided_slice %65 {offsets = [1, 0], sizes = [1, 384], strides = [1, 1]} : vector<8x384xf32> to vector<1x384xf32>
    %80 = vector.broadcast %78 : vector<8x1xf32> to vector<8x384xf32>
    %81 = vector.broadcast %79 : vector<1x384xf32> to vector<8x384xf32>
    %82 = arith.mulf %80, %81 : vector<8x384xf32>
    %83 = arith.addf %77, %82 : vector<8x384xf32>
    %84 = vector.extract_strided_slice %67 {offsets = [0, 2], sizes = [8, 1], strides = [1, 1]} : vector<8x8xf32> to vector<8x1xf32>
    %85 = vector.extract_strided_slice %65 {offsets = [2, 0], sizes = [1, 384], strides = [1, 1]} : vector<8x384xf32> to vector<1x384xf32>
    %86 = vector.broadcast %84 : vector<8x1xf32> to vector<8x384xf32>
    %87 = vector.broadcast %85 : vector<1x384xf32> to vector<8x384xf32>
    %88 = arith.mulf %86, %87 : vector<8x384xf32>
    %89 = arith.addf %83, %88 : vector<8x384xf32>
    %90 = vector.extract_strided_slice %67 {offsets = [0, 3], sizes = [8, 1], strides = [1, 1]} : vector<8x8xf32> to vector<8x1xf32>
    %91 = vector.extract_strided_slice %65 {offsets = [3, 0], sizes = [1, 384], strides = [1, 1]} : vector<8x384xf32> to vector<1x384xf32>
    %92 = vector.broadcast %90 : vector<8x1xf32> to vector<8x384xf32>
    %93 = vector.broadcast %91 : vector<1x384xf32> to vector<8x384xf32>
    %94 = arith.mulf %92, %93 : vector<8x384xf32>
    %95 = arith.addf %89, %94 : vector<8x384xf32>
    %cst_13 = arith.constant 5.000000e-01 : f32
    %96 = vector.broadcast %cst_13 : f32 to vector<8x384xf32>
    %97 = arith.mulf %96, %95 : vector<8x384xf32>
    %98 = math.tanh %97 : vector<8x384xf32>
    %cst_14 = arith.constant 1.000000e+00 : f32
    %99 = vector.broadcast %cst_14 : f32 to vector<8x384xf32>
    %100 = arith.addf %98, %99 : vector<8x384xf32>
    %cst_15 = arith.constant 5.000000e-01 : f32
    %101 = vector.broadcast %cst_15 : f32 to vector<8x384xf32>
    %102 = arith.mulf %101, %100 : vector<8x384xf32>
    %103 = vector.extract_strided_slice %1 {offsets = [3, 0, 0], sizes = [1, 8, 8], strides = [1, 1, 1]} : vector<4x8x8xf32> to vector<1x8x8xf32>
    %104 = vector.shape_cast %103 : vector<1x8x8xf32> to vector<8x8xf32>
    %105 = vector.extract_strided_slice %2 {offsets = [3, 0, 0], sizes = [1, 8, 1], strides = [1, 1, 1]} : vector<4x8x1xf32> to vector<1x8x1xf32>
    %106 = vector.shape_cast %105 : vector<1x8x1xf32> to vector<8x1xf32>
    %107 = vector.shape_cast %106 : vector<8x1xf32> to vector<8x1xf32>
    %108 = vector.broadcast %107 : vector<8x1xf32> to vector<8x384xf32>
    %109 = vector.extract_strided_slice %104 {offsets = [0, 0], sizes = [8, 1], strides = [1, 1]} : vector<8x8xf32> to vector<8x1xf32>
    %110 = vector.extract_strided_slice %102 {offsets = [0, 0], sizes = [1, 384], strides = [1, 1]} : vector<8x384xf32> to vector<1x384xf32>
    %111 = vector.broadcast %109 : vector<8x1xf32> to vector<8x384xf32>
    %112 = vector.broadcast %110 : vector<1x384xf32> to vector<8x384xf32>
    %113 = arith.mulf %111, %112 : vector<8x384xf32>
    %114 = arith.addf %108, %113 : vector<8x384xf32>
    %115 = vector.extract_strided_slice %104 {offsets = [0, 1], sizes = [8, 1], strides = [1, 1]} : vector<8x8xf32> to vector<8x1xf32>
    %116 = vector.extract_strided_slice %102 {offsets = [1, 0], sizes = [1, 384], strides = [1, 1]} : vector<8x384xf32> to vector<1x384xf32>
    %117 = vector.broadcast %115 : vector<8x1xf32> to vector<8x384xf32>
    %118 = vector.broadcast %116 : vector<1x384xf32> to vector<8x384xf32>
    %119 = arith.mulf %117, %118 : vector<8x384xf32>
    %120 = arith.addf %114, %119 : vector<8x384xf32>
    %cst_16 = arith.constant 5.000000e-01 : f32
    %121 = vector.broadcast %cst_16 : f32 to vector<8x384xf32>
    %122 = arith.mulf %121, %120 : vector<8x384xf32>
    %123 = math.tanh %122 : vector<8x384xf32>
    %cst_17 = arith.constant 1.000000e+00 : f32
    %124 = vector.broadcast %cst_17 : f32 to vector<8x384xf32>
    %125 = arith.addf %123, %124 : vector<8x384xf32>
    %cst_18 = arith.constant 5.000000e-01 : f32
    %126 = vector.broadcast %cst_18 : f32 to vector<8x384xf32>
    %127 = arith.mulf %126, %125 : vector<8x384xf32>
    %128 = vector.extract_strided_slice %127 {offsets = [0, 0], sizes = [1, 384], strides = [1, 1]} : vector<8x384xf32> to vector<1x384xf32>
    %c0_19 = arith.constant 0 : index
    %c0_20 = arith.constant 0 : index
    %129 = vector.load %arg4[%c0_19, %c0_20] : memref<1x384xf32, #tpu.memory_space<vmem>>, vector<1x384xf32>
    tpu.vector_store %arg4[%c0_19, %c0_20], %128 {strides = array<i32>} : memref<1x384xf32, #tpu.memory_space<vmem>>, vector<1x384xf32>,
    return
  }
  func.func @transform_0(%arg0: i32) -> (i32, i32) {
    %c0_i32 = arith.constant 0 : i32
    %c0_i32_0 = arith.constant 0 : i32
    return %arg0, %c0_i32 : i32, i32
  }
  func.func @transform_1(%arg0: i32) -> (i32, i32, i32) {
    %c0_i32 = arith.constant 0 : i32
    %c0_i32_0 = arith.constant 0 : i32
    %c0_i32_1 = arith.constant 0 : i32
    %c0_i32_2 = arith.constant 0 : i32
    return %c0_i32, %c0_i32_0, %c0_i32_1 : i32, i32, i32
  }
  func.func @transform_2(%arg0: i32) -> (i32, i32, i32) {
    %c0_i32 = arith.constant 0 : i32
    %c0_i32_0 = arith.constant 0 : i32
    %c0_i32_1 = arith.constant 0 : i32
    %c0_i32_2 = arith.constant 0 : i32
    return %c0_i32, %c0_i32_0, %c0_i32_1 : i32, i32, i32
  }
  func.func @transform_3(%arg0: i32) -> (i32, i32) {
    %c0_i32 = arith.constant 0 : i32
    %c0_i32_0 = arith.constant 0 : i32
    return %c0_i32, %arg0 : i32, i32
  }
}

</mosaic_0001>

<bundles_post_ra>
// kernel: tpu_custom_call.1
= control target key start
LH: loop header
LB: loop body
LE: loop exit
PB: predicated region body
PF: predicated region fallthrough
CT: control target
= control target key end

     0   :  { %8 = vsyncpa [#allocation3], 0  ;;  %s1598_s0 = inlined_call_operand.vmem [shape: f32[600,8], index: 0, kind: input, shape index: {}]   ;;  %s1599_s1 = inlined_call_operand.vmem [shape: f32[4,8,8], index: 1, kind: input, shape index: {}]   ;;  %s1600_s2 = inlined_call_operand.vmem [shape: f32[4,8,1], index: 2, kind: input, shape index: {}]   ;;  %s1601_s3 = inlined_call_operand.hbm [shape: f32[1,768], index: 3, kind: output, shape index: {}]  }
   0x1   :  { %10 = vsyncpa [#allocation3 + $0x1], 0  ;;  %s1303_s12 = smov 0   ;;  %s1305_s13 = smov 0  }
   0x2   :  { %s1307_s14 = smov 0   ;;  %s1309_s15 = smov 0  }
   0x3 LB: > { %s977_s16 = sadd.s32 4294967295, %s1271_s15   ;;  %s978_s17 = sadd.s32 4294967294, %s1271_s15   ;;  %s1271_s15 = sphi %s1309_s15, %s1607_s15   ;;  %s1267_s14 = sphi %s1307_s14, %s1606_s14   ;;  %s1263_s13 = sphi %s1305_s13, %s1605_s13   ;;  %s1259_s12 = sphi %s1303_s12, %s1604_s12  }
   0x4   : > { %s1326_s18 = sadd.s32 1, %s1271_s15   ;;  %s91_s19 = sadd.s32 1, %s1267_s14 }
   0x5   : > { %s88_s20 = ssub.s32 %s1271_s15, %s1326_s18  ;;  %p101_p0 = scmp.ne.s32.totalorder %s1267_s14, %s1263_s13 }
   0x6   : > { %p89_p1 = scmp.eq.s32.totalorder %s88_s20, 0  ;;  %p102_p2 = scmp.eq.s32.totalorder %s977_s16, 1 }
   0x7   : > { %p107_p3 = scmp.ne.s32.totalorder %s1263_s13, %s1259_s12  ;;  %p108_p4 = scmp.eq.s32.totalorder %s978_s17, 1 }
   0x8   : > { %s1336_s21 = scalar_select %p89_p1, %s1267_s14, %s91_s19  }
   0x9   : > { %p1338_p5 = por %p102_p2, %p101_p0  ;;  %p1342_p6 = por %p108_p4, %p107_p3 }
   0xa   : > { %p981_p7 = scmp.ge.s32.totalorder %s1271_s15, 1  ;;  %p149_p8 = scmp.lt.s32.totalorder %s1271_s15, 3 }
   0xc   : > { %p150_p9 = pnand %p981_p7, %p149_p8 }
   0xd   : > { %s1348_s24 = smul.u32 (!%p150_p9), 48, %s977_s16  ;;  %s174_s28 = sand.u32 (!%p150_p9), 1, %s1263_s13  }
   0xe   : > { %153 = sbr.rel (%p150_p9) target bundleno = 424 (0x1a8), region = 32  ;;  %s905_s8 = scalar_lea.sflag (!%p150_p9), [#allocation3], %s174_s28 }
   0xf   : > { %p182_p10 = scmp.lt.s32.totalorder (!%p150_p9), %s1348_s24, 74  ;;  %s1123_s29 = smul.u32 (!%p150_p9), 3, %s174_s28 }
  0x11   : > { %s176_s30 = scalar_lea.vmem (!%p150_p9), [#allocation2], %s1123_s29 }
  0x13   : > { %v1353_v0 = vld [vmem:[%s1599_s1] sm:$0xff]  ;;  %v1273_v1 = vmov 0.0   ;;  %vm253_vm0 = vcmask 64512   ;;  %vm1274_vm1 = vmmov 0   ;;  %v245_v3 = vld [vmem:[%s1600_s2 + $0x8] sm:$0xff]  ;;  %v1275_v4 = vmov 0  }
  0x14   : > { %1088 = vmatprep.subr.mxu1 %v1273_v1  ;;  %1120 = vmatprep.mubr.msk.f32.mxu1 %vm1274_vm1, %v1273_v1  ;;  %v244_v2 = vld [vmem:[%s1600_s2] sm:$0xff]  ;;  %s183_s4 = scalar_select %p182_p10, %s1348_s24, 74  ;;  %v241_v5 = vld [vmem:[%s1599_s1 + $0x8] sm:$0xff]  ;;  %v1276_v9 = vmov 1   ;;  %v1277_v14 = vmov 2   ;;  %v1278_v17 = vmov 3  }
  0x15   : > { %1069 = vmatprep.mubr.msk.f32.mxu0 %vm253_vm0, %v1353_v0  ;;  %1172 = vset.pattern.permute.xlu0 %v1275_v4  ;;  %v1279_v19 = vmov 5   ;;  %v1280_v23 = vmov 4   ;;  %v242_v26 = vld [vmem:[%s1599_s1 + $0x10] sm:$0xff]  ;;  %v243_v29 = vld [vmem:[%s1599_s1 + $0x18] sm:$0xff] }
  0x16   : > { %250 = vperm.xlu0 %1172, %v244_v2   ;;  %1173 = vset.pattern.permute.xlu1 %v1275_v4  ;;  %s982_s7 = sshll.u32 %s183_s4, 3  ;;  %v246_v32 = vld [vmem:[%s1600_s2 + $0x10] sm:$0xff]  ;;  %v247_v45 = vld [vmem:[%s1600_s2 + $0x18] sm:$0xff]  ;;  %s919_s4 = sshll.u32 %s176_s30, 4  ;;  %s920_s4 = int_to_ptr.vmem [resolvable:$true] %s919_s4 }
  0x17   : > { %556 = vperm.xlu1 %1173, %v245_v3   ;;  %s1375_s10 = scalar_lea.vmem %s1598_s0, %s982_s7  ;;  %s917_s7 = scalar_lea.hbm %s1601_s3, %s1348_s24 }
  0x18   : > { %v223_v6 = vld [vmem:[%s1375_s10 + $0xf8] sm:$0xff]  ;;  %v222_v10 = vld [vmem:[%s1375_s10 + $0xf0] sm:$0xff]  ;;  %v221_v13 = vld [vmem:[%s1375_s10 + $0xe8] sm:$0xff]  ;;  %s1211_s9 = scalar_lea.vmem %s920_s4, 48 }
  0x19   : > { %v239_v7 = vld [vmem:[%s1375_s10 + $0x178] sm:$0xff]  ;;  %1037 = vmatprep.subr.msk.mxu0 %vm253_vm0, %v223_v6  ;;  %v238_v11 = vld [vmem:[%s1375_s10 + $0x170] sm:$0xff]  ;;  %v237_v15 = vld [vmem:[%s1375_s10 + $0x168] sm:$0xff]  ;;  %p1212_p11 = scmp.ne.s32.totalorder %s920_s4, %s1211_s9 }
  0x1a   : > { %561 = vperm.xlu0 %1172, %v241_v5   ;;  %v207_v8 = vld [vmem:[%s1375_s10 + $0x78] sm:$0xff]  ;;  %1089 = vmatpush3.xpose.msk.msra.mxu1 %vm253_vm0, %v239_v7  ;;  %v206_v12 = vld [vmem:[%s1375_s10 + $0x70] sm:$0xff]  ;;  %v205_v16 = vld [vmem:[%s1375_s10 + $0x68] sm:$0xff] }
  0x1b   : > { %1174 = vset.pattern.permute.xlu1 %v1276_v9  ;;  %1038 = vmatpush3.xpose.msk.msra.mxu0 %vm253_vm0, %v207_v8  ;;  %v220_v18 = vld [vmem:[%s1375_s10 + $0xe0] sm:$0xff]  ;;  %v219_v22 = vld [vmem:[%s1375_s10 + $0xd8] sm:$0xff]  ;;  %v218_v27 = vld [vmem:[%s1375_s10 + $0xd0] sm:$0xff]  ;;  %p1213_p12 = pnand %p1212_p11, %p1338_p5 }
  0x1c   : > { %1090 = vmatprep.subr.mxu1 %v1273_v1  ;;  %1039 = vmatprep.subr.msk.mxu0 %vm253_vm0, %v222_v10  ;;  %v236_v20 = vld [vmem:[%s1375_s10 + $0x160] sm:$0xff]  ;;  %v235_v24 = vld [vmem:[%s1375_s10 + $0x158] sm:$0xff]  ;;  %v234_v28 = vld [vmem:[%s1375_s10 + $0x150] sm:$0xff] }
  0x1d   : > { %583 = vperm.xlu1 %1174, %v241_v5   ;;  %v204_v21 = vld [vmem:[%s1375_s10 + $0x60] sm:$0xff]  ;;  %v203_v25 = vld [vmem:[%s1375_s10 + $0x58] sm:$0xff]  ;;  %v202_v30 = vld [vmem:[%s1375_s10 + $0x50] sm:$0xff]  ;;  %p1214_p13 = pneg %p1213_p12 }
  0x1e   : > { %1175 = vset.pattern.permute.xlu0 %v1277_v14  ;;  %1091 = vmatpush3.xpose.msk.msra.mxu1 %vm253_vm0, %v238_v11  ;;  %v217_v31 = vld [vmem:[%s1375_s10 + $0xc8] sm:$0xff]  ;;  %v216_v35 = vld [vmem:[%s1375_s10 + $0xc0] sm:$0xff]  ;;  %v215_v38 = vld [vmem:[%s1375_s10 + $0xb8] sm:$0xff]  ;;  %v564_v11 = vlaneseq }
  0x1f   : > { %605 = vperm.xlu0 %1175, %v241_v5   ;;  %1040 = vmatpush3.xpose.msk.msra.mxu0 %vm253_vm0, %v206_v12  ;;  %v233_v33 = vld [vmem:[%s1375_s10 + $0x148] sm:$0xff]  ;;  %v232_v36 = vld [vmem:[%s1375_s10 + $0x140] sm:$0xff]  ;;  %v231_v39 = vld [vmem:[%s1375_s10 + $0x138] sm:$0xff] }
  0x20   : > { %1092 = vmatprep.subr.mxu1 %v1273_v1  ;;  %1041 = vmatprep.subr.msk.mxu0 %vm253_vm0, %v221_v13  ;;  %v201_v34 = vld [vmem:[%s1375_s10 + $0x48] sm:$0xff]  ;;  %v200_v37 = vld [vmem:[%s1375_s10 + $0x40] sm:$0xff]  ;;  %v199_v40 = vld [vmem:[%s1375_s10 + $0x38] sm:$0xff]  ;;  %v1516_v13 = vshrl.u32 %v564_v11, 7  ;;  %vm901_vm2 = vcmp.lt.s32.totalorder %v564_v11, 384 }
  0x21   : > { %1176 = vset.pattern.permute.xlu1 %v1278_v17  ;;  %v214_v41 = vld [vmem:[%s1375_s10 + $0xb0] sm:$0xff]  ;;  %v213_v44 = vld [vmem:[%s1375_s10 + $0xa8] sm:$0xff]  ;;  %v212_v48 = vld [vmem:[%s1375_s10 + $0xa0] sm:$0xff] }
  0x22   : > { %627 = vperm.xlu1 %1176, %v241_v5   ;;  %1093 = vmatpush3.xpose.msk.msra.mxu1 %vm253_vm0, %v237_v15  ;;  %v230_v42 = vld [vmem:[%s1375_s10 + $0x130] sm:$0xff]  ;;  %v229_v46 = vld [vmem:[%s1375_s10 + $0x128] sm:$0xff]  ;;  %v228_v49 = vld [vmem:[%s1375_s10 + $0x120] sm:$0xff] }
  0x23   : > { %1178 = vset.pattern.permute.xlu0 %v1279_v19  ;;  %1042 = vmatpush3.xpose.msk.msra.mxu0 %vm253_vm0, %v205_v16  ;;  %v198_v43 = vld [vmem:[%s1375_s10 + $0x30] sm:$0xff]  ;;  %v197_v47 = vld [vmem:[%s1375_s10 + $0x28] sm:$0xff]  ;;  %v196_v50 = vld [vmem:[%s1375_s10 + $0x20] sm:$0xff]  ;;  %v1519_v16 = vsub.s32 0, %v1516_v13 }
  0x24   : > { %1094 = vmatprep.subr.mxu1 %v1273_v1  ;;  %1043 = vmatprep.subr.msk.mxu0 %vm253_vm0, %v220_v18  ;;  %v211_v51 = vld [vmem:[%s1375_s10 + $0x98] sm:$0xff]  ;;  %v210_v54 = vld [vmem:[%s1375_s10 + $0x90] sm:$0xff]  ;;  %v209_v57 = vld [vmem:[%s1375_s10 + $0x88] sm:$0xff] }
  0x25   : > { %671 = vperm.xlu0 %1178, %v241_v5   ;;  %v227_v52 = vld [vmem:[%s1375_s10 + $0x118] sm:$0xff]  ;;  %v226_v55 = vld [vmem:[%s1375_s10 + $0x110] sm:$0xff]  ;;  %v225_v58 = vld [vmem:[%s1375_s10 + $0x108] sm:$0xff] }
  0x26   : > { %1177 = vset.pattern.permute.xlu1 %v1280_v23  ;;  %1095 = vmatpush3.xpose.msk.msra.mxu1 %vm253_vm0, %v236_v20  ;;  %v195_v53 = vld [vmem:[%s1375_s10 + $0x18] sm:$0xff]  ;;  %v194_v56 = vld [vmem:[%s1375_s10 + $0x10] sm:$0xff]  ;;  %v193_v59 = vld [vmem:[%s1375_s10 + $0x8] sm:$0xff] }
  0x27   : > { %649 = vperm.xlu1 %1177, %v241_v5   ;;  %1044 = vmatpush3.xpose.msk.msra.mxu0 %vm253_vm0, %v204_v21  ;;  %v208_v60 = vld [vmem:[%s1375_s10 + $0x80] sm:$0xff] }
  0x28   : > { %1096 = vmatprep.subr.mxu1 %v1273_v1  ;;  %1045 = vmatprep.subr.msk.mxu0 %vm253_vm0, %v219_v22  ;;  %v224_v61 = vld [vmem:[%s1375_s10 + $0x100] sm:$0xff] }
  0x29   : > { %1180 = vset.pattern.permute.xlu0 %v1276_v9  ;;  %v192_v62 = vld [vmem:[%s1375_s10] sm:$0xff]  ;;  %s1282_s10 = smov [#allocation2]  }
  0x2a   : > { %733 = vperm.xlu0 %1180, %v242_v26   ;;  %1097 = vmatpush3.xpose.msk.msra.mxu1 %vm253_vm0, %v235_v24  ;;  %v1525_v24 = vsub.s32 3, %v1516_v13  ;;  %s1215_s11 = sshll.u32 %s1282_s10, 4  ;;  %s1216_s11 = int_to_ptr.vmem [resolvable:$false] %s1215_s11 }
  0x2b   : > { %1179 = vset.pattern.permute.xlu1 %v1275_v4  ;;  %1046 = vmatpush3.xpose.msk.msra.mxu0 %vm253_vm0, %v203_v25  ;;  %v1528_v25 = vsub.s32 2, %v1516_v13  ;;  %s1217_s16 = scalar_lea.vmem %s1216_s11, 96  ;;  %p1218_p0 = scmp.lt.s32.totalorder %s920_s4, %s1216_s11 }
  0x2c   : > { %1098 = vmatprep.subr.mxu1 %v1273_v1  ;;  %1047 = vmatprep.subr.msk.mxu0 %vm253_vm0, %v218_v27  ;;  %p1219_p1 = scmp.lt.s32.totalorder %s1217_s16, %s1211_s9 }
  0x2d   : > { %711 = vperm.xlu1 %1179, %v242_v26  }
  0x2e   : > { %1183 = vset.pattern.permute.xlu0 %v1275_v4  ;;  %1099 = vmatpush3.xpose.msk.msra.mxu1 %vm253_vm0, %v234_v28  ;;  %p1220_p2 = por %p1219_p1, %p1218_p0 }
  0x2f   : > { %817 = vperm.xlu0 %1183, %v243_v29   ;;  %1048 = vmatpush3.xpose.msk.msra.mxu0 %vm253_vm0, %v202_v30 }
  0x30   : > { %1100 = vmatprep.subr.mxu1 %v1273_v1  ;;  %1049 = vmatprep.subr.msk.mxu0 %vm253_vm0, %v217_v31  ;;  %p1221_p3 = pnand %p1220_p2, %p1214_p13 }
  0x31   : > { %706 = vperm.xlu1 %1179, %v246_v32  }
  0x32   : > { %1101 = vmatpush3.xpose.msk.msra.mxu1 %vm253_vm0, %v233_v33 }
  0x33   : > { %1186 = vset.pattern.permute.xlu0 %v1276_v9  ;;  %1050 = vmatpush3.xpose.msk.msra.mxu0 %vm253_vm0, %v201_v34 }
  0x34   : > { %1102 = vmatprep.subr.mxu1 %v1273_v1  ;;  %1051 = vmatprep.subr.msk.mxu0 %vm253_vm0, %v216_v35 }
  0x35   : > { %1181 = vset.pattern.permute.xlu1 %v1277_v14 }
  0x36   : > { %755 = vperm.xlu1 %1181, %v242_v26   ;;  %1103 = vmatpush3.xpose.msk.msra.mxu1 %vm253_vm0, %v232_v36 }
  0x37   : > { %1052 = vmatpush3.xpose.msk.msra.mxu0 %vm253_vm0, %v200_v37  ;;  %1104 = vmatprep.subr.mxu1 %v1273_v1  ;;  %v654_v37 = vsub.s32 4, %v1516_v13 }
  0x38   : > { %1053 = vmatprep.subr.msk.mxu0 %vm253_vm0, %v215_v38 }
  0x3a   : > { %1182 = vset.pattern.permute.xlu1 %v1278_v17  ;;  %1105 = vmatpush3.xpose.msk.msra.mxu1 %vm253_vm0, %v231_v39  ;;  %v1522_v17 = vsub.s32 1, %v1516_v13 }
  0x3b   : > { %777 = vperm.xlu1 %1182, %v242_v26   ;;  %1054 = vmatpush3.xpose.msk.msra.mxu0 %vm253_vm0, %v199_v40 }
  0x3c   : > { %1106 = vmatprep.subr.mxu1 %v1273_v1  ;;  %1055 = vmatprep.subr.msk.mxu0 %vm253_vm0, %v214_v41 }
  0x3e   : > { %1107 = vmatpush3.xpose.msk.msra.mxu1 %vm253_vm0, %v230_v42 }
  0x3f   : > { %1184 = vset.pattern.permute.xlu1 %v1275_v4  ;;  %1056 = vmatpush3.xpose.msk.msra.mxu0 %vm253_vm0, %v198_v43 }
  0x40   : > { %1108 = vmatprep.subr.mxu1 %v1273_v1  ;;  %1057 = vmatprep.subr.msk.mxu0 %vm253_vm0, %v213_v44 }
  0x41   : > { %812 = vperm.xlu1 %1184, %v247_v45  }
  0x42   : > { %1109 = vmatpush3.xpose.msk.msra.mxu1 %vm253_vm0, %v229_v46  ;;  %v676_v46 = vsub.s32 5, %v1516_v13 }
  0x43   : > { %1058 = vmatpush3.xpose.msk.msra.mxu0 %vm253_vm0, %v197_v47  ;;  %1110 = vmatprep.subr.mxu1 %v1273_v1 }
  0x44   : > { %1059 = vmatprep.subr.msk.mxu0 %vm253_vm0, %v212_v48 }
  0x45   : > { %1185 = vset.pattern.permute.xlu1 %v1276_v9 }
  0x46   : > { %839 = vperm.xlu1 %1185, %v243_v29   ;;  %1111 = vmatpush3.xpose.msk.msra.mxu1 %vm253_vm0, %v228_v49 }
  0x47   : > { %1060 = vmatpush3.xpose.msk.msra.mxu0 %vm253_vm0, %v196_v50  ;;  %1112 = vmatprep.subr.mxu1 %v1273_v1 }
  0x48   : > { %1061 = vmatprep.subr.msk.mxu0 %vm253_vm0, %v211_v51 }
  0x4a   : > { %1113 = vmatpush3.xpose.msk.msra.mxu1 %vm253_vm0, %v227_v52 }
  0x4b   : > { %1062 = vmatpush3.xpose.msk.msra.mxu0 %vm253_vm0, %v195_v53  ;;  %1114 = vmatprep.subr.mxu1 %v1273_v1 }
  0x4c   : > { %1063 = vmatprep.subr.msk.mxu0 %vm253_vm0, %v210_v54 }
  0x4e   : > { %1115 = vmatpush3.xpose.msk.msra.mxu1 %vm253_vm0, %v226_v55 }
  0x4f   : > { %1064 = vmatpush3.xpose.msk.msra.mxu0 %vm253_vm0, %v194_v56  ;;  %1116 = vmatprep.subr.mxu1 %v1273_v1 }
  0x50   : > { %1065 = vmatprep.subr.msk.mxu0 %vm253_vm0, %v209_v57 }
  0x52   : > { %1117 = vmatpush3.xpose.msk.msra.mxu1 %vm253_vm0, %v225_v58 }
  0x53   : > { %1066 = vmatpush3.xpose.msk.msra.mxu0 %vm253_vm0, %v193_v59  ;;  %1118 = vmatprep.subr.mxu1 %v1273_v1 }
  0x54   : > { %1067 = vmatprep.subr.msk.mxu0 %vm253_vm0, %v208_v60 }
  0x56   : > { %1119 = vmatpush3.xpose.msk.msra.mxu1 %vm253_vm0, %v224_v61 }
  0x57   : > { %1068 = vmatpush3.xpose.msk.msra.mxu0 %vm253_vm0, %v192_v62 }
  0x59   : > { %1121 = vmatmul.mubr.msk.f32.vlgmr.msra.gmra.mxu1 %vm253_vm0, %v1353_v0 }
  0x5a   : > { %1070 = vmatmul.mubr.msk.f32.vlgmr.msra.gmra.mxu0 %vm253_vm0, %v1353_v0 }
  0x91   : > { %v251_v63 = vpop.permute.xlu0 %250 }
  0x92   : > { %v557_v12 = vpop.permute.xlu1 %556 }
  0x95   : > { %v562_v26 = vpop.permute.xlu0 %561 }
  0x98   : > { %v584_v18 = vpop.permute.xlu1 %583 }
  0x9a   : > { %v606_v44 = vpop.permute.xlu0 %605 }
  0x9d   : > { %v628_v35 = vpop.permute.xlu1 %627 }
  0xa2   : > { %v650_v62 = vpop.permute.xlu1 %649 }
 0x119   : > { %v538_v2 = vpop.f32.mrf.mxu1 }
 0x11a   : > { %v539_v3 = vadd.f32 %v538_v2, %v251_v63  ;;  %v467_v4 = vpop.f32.mrf.mxu0 }
 0x11b   : > { %v468_v5 = vadd.f32 %v467_v4, %v251_v63  ;;  %v1122_v1 = vpop.f32.mrf.mxu1 }
 0x11c   : > { %v544_v6 = vmul.f32 0.5, %v539_v3  ;;  %v469_v7 = vpop.f32.mrf.mxu0 }
 0x11d   : > { %v542_v8 = vmul.f32 0.5, %v468_v5  ;;  %v470_v9 = vadd.f32 %v469_v7, %v251_v63 }
 0x11e   : > { %1187 = vtanh.f32 %v544_v6 }
 0x11f   : > { %1189 = vtanh.f32 %v542_v8  ;;  %v543_v10 = vmul.f32 0.5, %v470_v9  ;;  %v672_v8 = vpop.permute.xlu0 %671 }
 0x121   : > { %1191 = vtanh.f32 %v543_v10 }
 0x12b   : > { %v1188_v0 = vpop.eup %1187 }
 0x12c   : > { %v1190_v14 = vpop.eup %1189  ;;  %v550_v15 = vadd.f32 1.0, %v1188_v0 }
 0x12d   : > { %v548_v19 = vadd.f32 1.0, %v1190_v14 }
 0x12e   : > { %v1192_v20 = vpop.eup %1191  ;;  %v553_v21 = vmul.f32 0.5, %v550_v15 }
 0x12f   : > { %v551_v22 = vmul.f32 0.5, %v548_v19  ;;  %v549_v23 = vadd.f32 1.0, %v1192_v20 }
 0x130   : > { %v575_v27 = vrot.slane %v553_v21, %v1519_v16  ;;  %v597_v28 = vrot.slane %v553_v21, %v1522_v17  ;;  %v641_v32 = vrot.slane %v553_v21, %v1525_v24  ;;  %v619_v36 = vrot.slane %v553_v21, %v1528_v25 }
 0x131   : > { %v567_v29 = vrot.slane %v551_v22, %v1519_v16  ;;  %v552_v30 = vmul.f32 0.5, %v549_v23  ;;  %v589_v31 = vrot.slane %v551_v22, %v1522_v17  ;;  %v611_v41 = vrot.slane %v551_v22, %v1528_v25 }
 0x132   : > { %v578_v33 = vmul.f32 %v575_v27, %v562_v26  ;;  %v600_v34 = vmul.f32 %v597_v28, %v584_v18  ;;  %v633_v43 = vrot.slane %v551_v22, %v1525_v24  ;;  %v644_v50 = vmul.f32 %v641_v32, %v628_v35 }
 0x133   : > { %v576_v38 = vmul.f32 %v567_v29, %v562_v26  ;;  %v571_v39 = vrot.slane %v552_v30, %v1519_v16  ;;  %v593_v40 = vrot.slane %v552_v30, %v1522_v17  ;;  %v615_v45 = vrot.slane %v552_v30, %v1528_v25 }
 0x134   : > { %v581_v42 = vadd.f32 %v578_v33, %v557_v12  ;;  %v598_v49 = vmul.f32 %v589_v31, %v584_v18  ;;  %v637_v53 = vrot.slane %v552_v30, %v1525_v24  ;;  %v622_v54 = vmul.f32 %v619_v36, %v606_v44 }
 0x135   : > { %v577_v47 = vmul.f32 %v571_v39, %v562_v26  ;;  %v579_v48 = vadd.f32 %v576_v38, %v557_v12  ;;  %v599_v51 = vmul.f32 %v593_v40, %v584_v18  ;;  %v620_v57 = vmul.f32 %v611_v41, %v606_v44 }
 0x136   : > { %v603_v52 = vadd.f32 %v600_v34, %v581_v42  ;;  %v655_v58 = vrot.slane %v551_v22, %v654_v37  ;;  %v642_v59 = vmul.f32 %v633_v43, %v628_v35  ;;  %v621_v60 = vmul.f32 %v615_v45, %v606_v44 }
 0x137   : > { %v580_v55 = vadd.f32 %v577_v47, %v557_v12  ;;  %v601_v56 = vadd.f32 %v598_v49, %v579_v48  ;;  %v663_v63 = vrot.slane %v553_v21, %v654_v37  ;;  %v659_v4 = vrot.slane %v552_v30, %v654_v37  ;;  %v734_v49 = vpop.permute.xlu0 %733 }
 0x138   : > { %v625_v61 = vadd.f32 %v622_v54, %v603_v52  ;;  %v677_v5 = vrot.slane %v551_v22, %v676_v46  ;;  %v643_v1 = vmul.f32 %v637_v53, %v628_v35  ;;  %v685_v9 = vrot.slane %v553_v21, %v676_v46  ;;  %v712_v21 = vpop.permute.xlu1 %711 }
 0x139   : > { %v602_v2 = vadd.f32 %v599_v51, %v580_v55  ;;  %v623_v3 = vadd.f32 %v620_v57, %v601_v56  ;;  %v666_v7 = vmul.f32 %v663_v63, %v650_v62  ;;  %v664_v12 = vmul.f32 %v655_v58, %v650_v62 }
 0x13a   : > { %v647_v6 = vadd.f32 %v644_v50, %v625_v61  ;;  %v681_v14 = vrot.slane %v552_v30, %v676_v46  ;;  %v688_v18 = vmul.f32 %v685_v9, %v672_v8  ;;  %v665_v20 = vmul.f32 %v659_v4, %v650_v62 }
 0x13b   : > { %v624_v10 = vadd.f32 %v621_v60, %v602_v2  ;;  %v645_v0 = vadd.f32 %v642_v59, %v623_v3  ;;  %v686_v26 = vmul.f32 %v677_v5, %v672_v8 }
 0x13c   : > { %v669_v15 = vadd.f32 %v666_v7, %v647_v6  ;;  %v687_v29 = vmul.f32 %v681_v14, %v672_v8  ;;  %v707_v35 = vpop.permute.xlu1 %706 }
 0x13d   : > { %v646_v19 = vadd.f32 %v643_v1, %v624_v10  ;;  %v667_v23 = vadd.f32 %v664_v12, %v645_v0 }
 0x13e   : > { %v691_v27 = vadd.f32 %v688_v18, %v669_v15 }
 0x13f   : > { %v668_v28 = vadd.f32 %v665_v20, %v646_v19  ;;  %v689_v31 = vadd.f32 %v686_v26, %v667_v23 }
 0x140   : > { %v694_v22 = vmul.f32 0.5, %v691_v27  ;;  %v756_v44 = vpop.permute.xlu1 %755 }
 0x141   : > { %v690_v32 = vadd.f32 %v687_v29, %v668_v28  ;;  %v692_v33 = vmul.f32 0.5, %v689_v31 }
 0x142   : > { %1193 = vtanh.f32 %v694_v22 }
 0x143   : > { %v693_v34 = vmul.f32 0.5, %v690_v32  ;;  %1195 = vtanh.f32 %v692_v33 }
 0x144   : > { %v778_v63 = vpop.permute.xlu1 %777 }
 0x145   : > { %1197 = vtanh.f32 %v693_v34 }
 0x148   : > { %v813_v29 = vpop.permute.xlu1 %812 }
 0x14f   : > { %v1194_v30 = vpop.eup %1193 }
 0x150   : > { %v1196_v36 = vpop.eup %1195  ;;  %v700_v37 = vadd.f32 1.0, %v1194_v30  ;;  %v818_v30 = vpop.permute.xlu0 %817 }
 0x151   : > { %v698_v38 = vadd.f32 1.0, %v1196_v36 }
 0x152   : > { %v1198_v39 = vpop.eup %1197  ;;  %v703_v40 = vmul.f32 0.5, %v700_v37 }
 0x153   : > { %v699_v41 = vadd.f32 1.0, %v1198_v39  ;;  %v701_v42 = vmul.f32 0.5, %v698_v38  ;;  %v840_v39 = vpop.permute.xlu1 %839 }
 0x154   : > { %v725_v43 = vrot.slane %v703_v40, %v1519_v16  ;;  %v747_v51 = vrot.slane %v703_v40, %v1522_v17  ;;  %v769_v55 = vrot.slane %v703_v40, %v1528_v25  ;;  %v791_v2 = vrot.slane %v703_v40, %v1525_v24 }
 0x155   : > { %v702_v45 = vmul.f32 0.5, %v699_v41  ;;  %v717_v46 = vrot.slane %v701_v42, %v1519_v16  ;;  %v761_v48 = vrot.slane %v701_v42, %v1528_v25  ;;  %v739_v50 = vrot.slane %v701_v42, %v1522_v17 }
 0x156   : > { %v728_v47 = vmul.f32 %v725_v43, %v712_v21  ;;  %v783_v56 = vrot.slane %v701_v42, %v1525_v24  ;;  %v750_v3 = vmul.f32 %v747_v51, %v734_v49  ;;  %v772_v7 = vmul.f32 %v769_v55, %v756_v44 }
 0x157   : > { %v721_v52 = vrot.slane %v702_v45, %v1519_v16  ;;  %v726_v53 = vmul.f32 %v717_v46, %v712_v21  ;;  %v743_v57 = vrot.slane %v702_v45, %v1522_v17  ;;  %v765_v60 = vrot.slane %v702_v45, %v1528_v25 }
 0x158   : > { %v731_v54 = vadd.f32 %v728_v47, %v707_v35  ;;  %v748_v61 = vmul.f32 %v739_v50, %v734_v49  ;;  %v770_v62 = vmul.f32 %v761_v48, %v756_v44  ;;  %v787_v5 = vrot.slane %v702_v45, %v1525_v24 }
 0x159   : > { %v727_v58 = vmul.f32 %v721_v52, %v712_v21  ;;  %v729_v59 = vadd.f32 %v726_v53, %v707_v35  ;;  %v749_v1 = vmul.f32 %v743_v57, %v734_v49  ;;  %v771_v9 = vmul.f32 %v765_v60, %v756_v44 }
 0x15a   : > { %v753_v8 = vadd.f32 %v750_v3, %v731_v54  ;;  %v792_v10 = vmul.f32 %v783_v56, %v778_v63  ;;  %v794_v14 = vmul.f32 %v791_v2, %v778_v63  ;;  %v793_v25 = vmul.f32 %v787_v5, %v778_v63 }
 0x15b   : > { %v730_v4 = vadd.f32 %v727_v58, %v707_v35  ;;  %v751_v6 = vadd.f32 %v748_v61, %v729_v59 }
 0x15c   : > { %v775_v15 = vadd.f32 %v772_v7, %v753_v8 }
 0x15d   : > { %v752_v0 = vadd.f32 %v749_v1, %v730_v4  ;;  %v773_v12 = vadd.f32 %v770_v62, %v751_v6 }
 0x15e   : > { %v797_v20 = vadd.f32 %v794_v14, %v775_v15 }
 0x15f   : > { %v774_v18 = vadd.f32 %v771_v9, %v752_v0  ;;  %v795_v19 = vadd.f32 %v792_v10, %v773_v12 }
 0x160   : > { %v800_v27 = vmul.f32 0.5, %v797_v20 }
 0x161   : > { %v796_v23 = vadd.f32 %v793_v25, %v774_v18  ;;  %v798_v26 = vmul.f32 0.5, %v795_v19 }
 0x163   : > { %v799_v28 = vmul.f32 0.5, %v796_v23  ;;  %1199 = vtanh.f32 %v798_v26 }
 0x164   : > { %1201 = vtanh.f32 %v800_v27 }
 0x165   : > { %1203 = vtanh.f32 %v799_v28 }
 0x170   : > { %v1200_v24 = vpop.eup %1199 }
 0x171   : > { %v1202_v31 = vpop.eup %1201  ;;  %v804_v22 = vadd.f32 1.0, %v1200_v24 }
 0x172   : > { %v1204_v32 = vpop.eup %1203  ;;  %v806_v33 = vadd.f32 1.0, %v1202_v31 }
 0x173   : > { %v805_v34 = vadd.f32 1.0, %v1204_v32  ;;  %v807_v21 = vmul.f32 0.5, %v804_v22 }
 0x174   : > { %v809_v35 = vmul.f32 0.5, %v806_v33 }
 0x175   : > { %v808_v36 = vmul.f32 0.5, %v805_v34  ;;  %v845_v37 = vrot.slane %v807_v21, %v1522_v17  ;;  %v823_v38 = vrot.slane %v807_v21, %v1519_v16 }
 0x176   : > { %v853_v40 = vrot.slane %v809_v35, %v1522_v17  ;;  %v831_v41 = vrot.slane %v809_v35, %v1519_v16 }
 0x177   : > { %v849_v42 = vrot.slane %v808_v36, %v1522_v17  ;;  %v827_v43 = vrot.slane %v808_v36, %v1519_v16  ;;  %v832_v44 = vmul.f32 %v823_v38, %v818_v30  ;;  %v854_v46 = vmul.f32 %v845_v37, %v840_v39 }
 0x178   : > { %v834_v45 = vmul.f32 %v831_v41, %v818_v30  ;;  %v856_v49 = vmul.f32 %v853_v40, %v840_v39  ;;  %v1281_v16 = vmov 1966171168  }
 0x179   : > { %v833_v47 = vmul.f32 %v827_v43, %v818_v30  ;;  %v835_v48 = vadd.f32 %v832_v44, %v813_v29  ;;  %v855_v51 = vmul.f32 %v849_v42, %v840_v39  ;;  %v877_v17 = vunpack.c.l.s4 %v1281_v16 }
 0x17a   : > { %v837_v50 = vadd.f32 %v834_v45, %v813_v29 }
 0x17b   : > { %v836_v52 = vadd.f32 %v833_v47, %v813_v29  ;;  %v857_v53 = vadd.f32 %v854_v46, %v835_v48  ;;  %v878_v62 = vunpack.c.0.s8 %v877_v17 }
 0x17c   : > { %v859_v54 = vadd.f32 %v856_v49, %v837_v50 }
 0x17d   : > { %v858_v55 = vadd.f32 %v855_v51, %v836_v52  ;;  %v860_v56 = vmul.f32 0.5, %v857_v53  ;;  %v881_v6 = vsub.s32 %v878_v62, %v1516_v13 }
 0x17e   : > { %v862_v57 = vmul.f32 0.5, %v859_v54 }
 0x17f   : > { %v861_v58 = vmul.f32 0.5, %v858_v55  ;;  %1205 = vtanh.f32 %v860_v56 }
 0x180   : > { %1207 = vtanh.f32 %v862_v57 }
 0x181   : > { %1209 = vtanh.f32 %v861_v58 }
 0x18c   : > { %v1206_v59 = vpop.eup %1205 }
 0x18d   : > { %v1208_v60 = vpop.eup %1207  ;;  %v866_v61 = vadd.f32 1.0, %v1206_v59 }
 0x18e   : > { %v1210_v63 = vpop.eup %1209  ;;  %v868_v2 = vadd.f32 1.0, %v1208_v60 }
 0x18f   : > { %v867_v3 = vadd.f32 1.0, %v1210_v63  ;;  %v869_v4 = vmul.f32 0.5, %v866_v61 }
 0x190   : > { %v871_v1 = vmul.f32 0.5, %v868_v2 }
 0x191   : > { %v870_v5 = vmul.f32 0.5, %v867_v3 }
 0x192   : > { %v889_v9 = vrot.slane %v871_v1, %v881_v6 }
 0x193   : > { %v875_v7 = vcombine.low %v869_v4, %v870_v5 }
 0x195   : > { %v882_v8 = vrot.slane %v875_v7, %v881_v6 }
 0x197   : > { %v890_v10 = vcombine.low %v882_v8, %v889_v9 }
 0x199   : > { %v897_v0 = vrot.slane %v890_v10, %v881_v6 }
 0x19b   : > { %903 = vst.msk [vmem:[%s176_s30] sm:$0x7] %vm901_vm2, %v897_v0 }
 0x19c   : > { %1224 = shalt.err (!%p1221_p3)
}
 0x19d   : > { %s1225_s17 = scalar_lea.hbm %s917_s7, 48  ;;  %s1229_s20 = scalar_lea.hbm %s1601_s3, 96 }
 0x19e   : > { %p1226_p4 = scmp.ne.s32.totalorder %s917_s7, %s1225_s17  ;;  %p1230_p9 = scmp.lt.s32.totalorder %s917_s7, %s1601_s3 }
 0x19f   : > { %p1231_p10 = scmp.lt.s32.totalorder %s1229_s20, %s1225_s17 }
 0x1a0   : > { %p1227_p7 = pnand %p1226_p4, %p1338_p5 }
 0x1a1   : > { %p1232_p11 = por %p1231_p10, %p1230_p9 }
 0x1a2   : > { %p1228_p8 = pneg %p1227_p7 }
 0x1a4   : > { %p1233_p12 = pnand %p1232_p11, %p1228_p8 }
 0x1a6   : > { %1236 = shalt.err (!%p1233_p12)
}
 0x1a7   : > { %1124 = dma.vmem_to_hbm [thread:$0]  (%p1338_p5), %s920_s4, 48, %s917_s7, %s905_s8  }
 0x1a8 PF: > { %p1130_p13 = scmp.ge.s32.totalorder %s1271_s15, 2  ;;  %s931_s27 = sand.u32 1, %s1259_s12  }
 0x1a9   : > { %s932_s28 = scalar_lea.sflag [#allocation3], %s931_s27 }
 0x1aa   : > { %p1127_p0 = pnand %p1130_p13, %p1342_p6 }
 0x1ac   : > { %p1128_p1 = pneg %p1127_p0 }
 0x1ae   : > { %1254 = dma.done.wait (%p1128_p1), %s932_s28, 48  }
 0x1af   : > { %1256 = vsyncadd (%p1128_p1), %s932_s28, 4294967248  ;;  %p13_p2 = scmp.ge.s32.totalorder %s1326_s18, 4   ;;  %s1604_s12 = smov %s1263_s13 }
 0x1b0   : > { %s1605_s13 = smov %s1267_s14  ;;  %s1606_s14 = smov %s1336_s21 }
 0x1b1   : > { %s1607_s15 = smov %s1326_s18  ;;  %15 = sbr.rel (!%p13_p2) target bundleno = 3 (0x3), region = 67 }
 0x1b6   :  { %937 = vsyncpa [#allocation3], 1 }
 0x1b7   :  { %939 = vsyncpa [#allocation3 + $0x1], 1 }

</bundles_post_ra>
